<compile_context>
chip_gen: v7x
topology: tpu7x:2x2x1
jax: 0.10.0
libtpu: 0.0.40
codegen_flags: <defaults>
</compile_context>

<pallas_src>
import jax
import jax.numpy as jnp
from jax import lax
from jax.experimental import pallas as pl
from jax.experimental.pallas import tpu as pltpu


def _model_kernel(ids_ref, m_ref, c_ref, out_ref):
    # ids_ref: (B, L) int32      m_ref: (Vp, Cp) f32 (fused emb@w1@w2, padded)
    # c_ref:   (1, Cp) f32       out_ref: (B, Cp) f32
    b, l = ids_ref.shape
    vp = m_ref.shape[0]

    ids = ids_ref[...]                                          # (B, L) i32
    vocab_iota = lax.broadcasted_iota(jnp.int32, (b, vp), 1)    # (B, Vp)

    # mean_onehot[b, v] = (1/L) * #\{l : ids[b, l] == v\}
    # Unrolled L-step VPU compare+accumulate (no seg matrix, no XLU reduce).
    acc = jnp.zeros((b, vp), jnp.float32)
    for i in range(l):  # L is small & static -> unrolled at trace time
        tok = ids[:, i:i + 1]                                   # (B, 1)
        acc = acc + (tok == vocab_iota).astype(jnp.float32)
    mean_onehot = acc * jnp.float32(1.0 / l)                    # (B, Vp)

    # Single MXU matmul against the fused affine table, lane-dense output.
    out_ref[...] = (
        jnp.dot(mean_onehot, m_ref[...], preferred_element_type=jnp.float32)
        + c_ref[...]
    )


def prepare_params(emb_table, w1, b1, w2, b2):
    """One-time (model-load) fusion + padding of all parameters.

    Exact because the eval-mode forward is affine:
        predict = mean_L(emb[x]) @ w1 @ w2 + b1 @ w2 + b2
    """
    V, H = emb_table.shape
    C = w2.shape[1]
    Vp = ((V + 127) // 128) * 128      # lane-dense contraction axis
    Cp = ((C + 127) // 128) * 128      # lane-dense output axis

    m = emb_table.astype(jnp.float32) @ w1.astype(jnp.float32) @ w2.astype(jnp.float32)
    c = b1.astype(jnp.float32) @ w2.astype(jnp.float32) + b2.astype(jnp.float32)

    m_p = jnp.zeros((Vp, Cp), jnp.float32).at[:V, :C].set(m)
    c_p = jnp.zeros((1, Cp), jnp.float32).at[0, :C].set(c)
    return m_p, c_p, C


def torch_model_forward(x_ids, m_table, c_bias, class_num):
    """Inference forward pass (target=None branch) of TorchModel."""
    B, L = x_ids.shape
    Vp, Cp = m_table.shape

    out_padded = pl.pallas_call(
        _model_kernel,
        out_shape=jax.ShapeDtypeStruct((B, Cp), jnp.float32),
        # Single invocation, no grid: every operand lives whole in VMEM once
        # (no double-buffered weight re-DMA, no per-step pipeline overhead).
        in_specs=[
            pl.BlockSpec(memory_space=pltpu.MemorySpace.VMEM),  # ids (B, L)
            pl.BlockSpec(memory_space=pltpu.MemorySpace.VMEM),  # fused table
            pl.BlockSpec(memory_space=pltpu.MemorySpace.VMEM),  # fused bias
        ],
        out_specs=pl.BlockSpec(memory_space=pltpu.MemorySpace.VMEM),
    )(x_ids.astype(jnp.int32), m_table, c_bias)

    return out_padded[:, :class_num]


if __name__ == "__main__":
    # config = {'hidden_size': 32, 'vocab_size': 20, 'max_length': 8, 'class_num': 4}
    hidden_size = 32
    vocab_size = 20 + 1      # nn.Embedding(vocab_size + 1, hidden_size)
    max_length = 8
    class_num = 4
    batch = 2

    key = jax.random.PRNGKey(0)
    k_emb, k_w1, k_b1, k_w2, k_b2, k_x = jax.random.split(key, 6)

    # Deterministic parameter init (shapes per TorchModel.__init__)
    emb_table = jax.random.normal(k_emb, (vocab_size, hidden_size),
                                  dtype=jnp.float32) * 0.1
    emb_table = emb_table.at[0].set(0.0)             # padding_idx=0
    # nn.Linear stores weight (out, in); we use transposed (in, out) for x @ W
    w1 = jax.random.normal(k_w1, (hidden_size, hidden_size),
                           dtype=jnp.float32) * 0.1
    b1 = jax.random.normal(k_b1, (hidden_size,), dtype=jnp.float32) * 0.1
    w2 = jax.random.normal(k_w2, (hidden_size, class_num),
                           dtype=jnp.float32) * 0.1
    b2 = jax.random.normal(k_b2, (class_num,), dtype=jnp.float32) * 0.1

    x_ids = jax.random.randint(k_x, (batch, max_length), 0, vocab_size,
                               dtype=jnp.int32)

    # One-time parameter fusion / padding (model-load time, not per call).
    m_table, c_bias, C = prepare_params(emb_table, w1, b1, w2, b2)

    predict = torch_model_forward(x_ids, m_table, c_bias, C)
    jax.block_until_ready(predict)

    # Pure-JAX reference check (embedding -> linear -> (eval) dropout ->
    # mean over L -> classify), matching the PyTorch forward.
    ref = emb_table[x_ids] @ w1 + b1
    ref = ref.mean(axis=1) @ w2 + b2
    assert predict.shape == ref.shape, (predict.shape, ref.shape)
    assert jnp.allclose(predict, ref, atol=1e-5), (predict, ref)

    print("KERNEL_OK")
</pallas_src>

<mosaic_0001>
module attributes {stable_mosaic.version = 11 : i64} {
  func.func @_model_kernel(%arg0: memref<2x8xi32, #tpu.memory_space<vmem>>, %arg1: memref<128x128xf32, #tpu.memory_space<vmem>>, %arg2: memref<1x128xf32, #tpu.memory_space<vmem>>, %arg3: memref<2x128xf32, #tpu.memory_space<vmem>>) attributes {dimension_semantics = [], scalar_prefetch = 0 : i64, scratch_operands = 0 : i64, tpu.core_type = #tpu.core_type<tc>} {
    %c0 = arith.constant 0 : index
    %c0_0 = arith.constant 0 : index
    %0 = vector.load %arg0[%c0, %c0_0] : memref<2x8xi32, #tpu.memory_space<vmem>>, vector<2x8xi32>
    %1 = tpu.iota {dimensions = array<i32: 1>} : vector<2x128xi32>
    %cst = arith.constant 0.000000e+00 : f32
    %2 = vector.broadcast %cst : f32 to vector<2x128xf32>
    %3 = vector.extract_strided_slice %0 {offsets = [0, 0], sizes = [2, 1], strides = [1, 1]} : vector<2x8xi32> to vector<2x1xi32>
    %4 = vector.broadcast %3 : vector<2x1xi32> to vector<2x128xi32>
    %5 = arith.cmpi eq, %4, %1 : vector<2x128xi32>
    %6 = arith.extui %5 : vector<2x128xi1> to vector<2x128xi32>
    %7 = arith.sitofp %6 : vector<2x128xi32> to vector<2x128xf32>
    %8 = arith.addf %2, %7 : vector<2x128xf32>
    %9 = vector.extract_strided_slice %0 {offsets = [0, 1], sizes = [2, 1], strides = [1, 1]} : vector<2x8xi32> to vector<2x1xi32>
    %10 = vector.broadcast %9 : vector<2x1xi32> to vector<2x128xi32>
    %11 = arith.cmpi eq, %10, %1 : vector<2x128xi32>
    %12 = arith.extui %11 : vector<2x128xi1> to vector<2x128xi32>
    %13 = arith.sitofp %12 : vector<2x128xi32> to vector<2x128xf32>
    %14 = arith.addf %8, %13 : vector<2x128xf32>
    %15 = vector.extract_strided_slice %0 {offsets = [0, 2], sizes = [2, 1], strides = [1, 1]} : vector<2x8xi32> to vector<2x1xi32>
    %16 = vector.broadcast %15 : vector<2x1xi32> to vector<2x128xi32>
    %17 = arith.cmpi eq, %16, %1 : vector<2x128xi32>
    %18 = arith.extui %17 : vector<2x128xi1> to vector<2x128xi32>
    %19 = arith.sitofp %18 : vector<2x128xi32> to vector<2x128xf32>
    %20 = arith.addf %14, %19 : vector<2x128xf32>
    %21 = vector.extract_strided_slice %0 {offsets = [0, 3], sizes = [2, 1], strides = [1, 1]} : vector<2x8xi32> to vector<2x1xi32>
    %22 = vector.broadcast %21 : vector<2x1xi32> to vector<2x128xi32>
    %23 = arith.cmpi eq, %22, %1 : vector<2x128xi32>
    %24 = arith.extui %23 : vector<2x128xi1> to vector<2x128xi32>
    %25 = arith.sitofp %24 : vector<2x128xi32> to vector<2x128xf32>
    %26 = arith.addf %20, %25 : vector<2x128xf32>
    %27 = vector.extract_strided_slice %0 {offsets = [0, 4], sizes = [2, 1], strides = [1, 1]} : vector<2x8xi32> to vector<2x1xi32>
    %28 = vector.broadcast %27 : vector<2x1xi32> to vector<2x128xi32>
    %29 = arith.cmpi eq, %28, %1 : vector<2x128xi32>
    %30 = arith.extui %29 : vector<2x128xi1> to vector<2x128xi32>
    %31 = arith.sitofp %30 : vector<2x128xi32> to vector<2x128xf32>
    %32 = arith.addf %26, %31 : vector<2x128xf32>
    %33 = vector.extract_strided_slice %0 {offsets = [0, 5], sizes = [2, 1], strides = [1, 1]} : vector<2x8xi32> to vector<2x1xi32>
    %34 = vector.broadcast %33 : vector<2x1xi32> to vector<2x128xi32>
    %35 = arith.cmpi eq, %34, %1 : vector<2x128xi32>
    %36 = arith.extui %35 : vector<2x128xi1> to vector<2x128xi32>
    %37 = arith.sitofp %36 : vector<2x128xi32> to vector<2x128xf32>
    %38 = arith.addf %32, %37 : vector<2x128xf32>
    %39 = vector.extract_strided_slice %0 {offsets = [0, 6], sizes = [2, 1], strides = [1, 1]} : vector<2x8xi32> to vector<2x1xi32>
    %40 = vector.broadcast %39 : vector<2x1xi32> to vector<2x128xi32>
    %41 = arith.cmpi eq, %40, %1 : vector<2x128xi32>
    %42 = arith.extui %41 : vector<2x128xi1> to vector<2x128xi32>
    %43 = arith.sitofp %42 : vector<2x128xi32> to vector<2x128xf32>
    %44 = arith.addf %38, %43 : vector<2x128xf32>
    %45 = vector.extract_strided_slice %0 {offsets = [0, 7], sizes = [2, 1], strides = [1, 1]} : vector<2x8xi32> to vector<2x1xi32>
    %46 = vector.broadcast %45 : vector<2x1xi32> to vector<2x128xi32>
    %47 = arith.cmpi eq, %46, %1 : vector<2x128xi32>
    %48 = arith.extui %47 : vector<2x128xi1> to vector<2x128xi32>
    %49 = arith.sitofp %48 : vector<2x128xi32> to vector<2x128xf32>
    %50 = arith.addf %44, %49 : vector<2x128xf32>
    %cst_1 = arith.constant 1.250000e-01 : f32
    %51 = vector.broadcast %cst_1 : f32 to vector<2x128xf32>
    %52 = arith.mulf %50, %51 : vector<2x128xf32>
    %c0_2 = arith.constant 0 : index
    %c0_3 = arith.constant 0 : index
    %53 = vector.load %arg1[%c0_2, %c0_3] : memref<128x128xf32, #tpu.memory_space<vmem>>, vector<128x128xf32>
    %cst_4 = arith.constant dense<0.000000e+00> : vector<2x128xf32>
    %54 = tpu.matmul %52, %53, %cst_4 {dimension_numbers = #tpu.dot_dimension_numbers<[1], [0], [0], [1], [0, 0, 1, 1], [], []>} : vector<2x128xf32>, vector<128x128xf32>, vector<2x128xf32> -> vector<2x128xf32>
    %c0_5 = arith.constant 0 : index
    %c0_6 = arith.constant 0 : index
    %55 = vector.load %arg2[%c0_5, %c0_6] : memref<1x128xf32, #tpu.memory_space<vmem>>, vector<1x128xf32>
    %56 = vector.broadcast %55 : vector<1x128xf32> to vector<2x128xf32>
    %57 = arith.addf %54, %56 : vector<2x128xf32>
    %c0_7 = arith.constant 0 : index
    %c0_8 = arith.constant 0 : index
    %58 = vector.load %arg3[%c0_7, %c0_8] : memref<2x128xf32, #tpu.memory_space<vmem>>, vector<2x128xf32>
    tpu.vector_store %arg3[%c0_7, %c0_8], %57 {strides = array<i32>} : memref<2x128xf32, #tpu.memory_space<vmem>>, vector<2x128xf32>,
    return
  }
}

</mosaic_0001>

<bundles_post_ra>
// kernel: tpu_custom_call.1
= control target key start
LH: loop header
LB: loop body
LE: loop exit
PB: predicated region body
PF: predicated region fallthrough
CT: control target
= control target key end

     0   :  { %8 = vsyncpa [#allocation3], 0  ;;  %s483_s0 = inlined_call_operand.hbm [shape: s32[2,8], index: 0, kind: input, shape index: {}]   ;;  %s484_s1 = inlined_call_operand.hbm [shape: f32[128,128], index: 1, kind: input, shape index: {}]   ;;  %s485_s2 = inlined_call_operand.vmem [shape: f32[1,128], index: 2, kind: input, shape index: {}]   ;;  %s486_s3 = inlined_call_operand.hbm [shape: f32[2,128], index: 3, kind: output, shape index: {}]  }
   0x1   :  { %9 = vsyncpa [#allocation6], 0 }
   0x2   :  { %10 = vsyncpa [#allocation4], 0  ;;  %s393_s12 = smov [#allocation2]   ;;  %s394_s14 = smov [#allocation5]  }
   0x3   :  { %s17_s13 = sshll.u32 %s393_s12, 4  ;;  %s26_s15 = sshll.u32 %s394_s14, 4  ;;  %s18_s13 = int_to_ptr.vmem [resolvable:$true] %s17_s13  ;;  %s429_s15 = int_to_ptr.vmem [resolvable:$true] %s26_s15 }
   0x4   :  { %s321_s18 = scalar_lea.hbm %s483_s0, 32 }
   0x5   :  { %p322_p0 = scmp.ne.s32.totalorder %s483_s0, %s321_s18  ;;  %p325_p1 = scmp.lt.u32.totalorder %s321_s18, %s483_s0 }
   0x7   :  { %p327_p2 = pnand %p325_p1, %p322_p0 }
   0x9   :  { %330 = shalt.err (!%p327_p2)
}
   0xa   :  { %s331_s23 = scalar_lea.vmem %s18_s13, 32  ;;  %p336_p4 = scmp.lt.s32.totalorder %s18_s13, %s18_s13 }
   0xb   :  { %p332_p3 = scmp.ne.s32.totalorder %s18_s13, %s331_s23  ;;  %p337_p5 = scmp.lt.s32.totalorder %s331_s23, %s331_s23 }
   0xd   :  { %p338_p6 = por %p337_p5, %p336_p4 }
   0xf   :  { %p339_p7 = pnand %p338_p6, %p332_p3 }
  0x11   :  { %342 = shalt.err (!%p339_p7)
}
  0x12   :  { %20 = dma.hbm_to_vmem [thread:$0]  %s483_s0, 32, %s18_s13, [#allocation3]  }
  0x13   :  { %s343_s28 = scalar_lea.hbm %s484_s1, 2048 }
  0x14   :  { %p344_p8 = scmp.ne.s32.totalorder %s484_s1, %s343_s28  ;;  %p347_p9 = scmp.lt.u32.totalorder %s343_s28, %s484_s1 }
  0x16   :  { %p349_p10 = pnand %p347_p9, %p344_p8 }
  0x18   :  { %352 = shalt.err (!%p349_p10)
}
  0x19   :  { %s353_s6 = scalar_lea.vmem %s429_s15, 2048  ;;  %p358_p12 = scmp.lt.s32.totalorder %s429_s15, %s429_s15 }
  0x1a   :  { %p354_p11 = scmp.ne.s32.totalorder %s429_s15, %s353_s6  ;;  %p359_p13 = scmp.lt.s32.totalorder %s353_s6, %s353_s6 }
  0x1c   :  { %p360_p0 = por %p359_p13, %p358_p12 }
  0x1e   :  { %p361_p1 = pnand %p360_p0, %p354_p11 }
  0x20   :  { %364 = shalt.err (!%p361_p1)
}
  0x21   :  { %s395_s0 = smov 128   ;;  %s396_s7 = smov 8  }
  0x22   :  { %32 = dma.hbm_to_vmem [thread:$0]  %s484_s1, 2048, %s429_s15, [#allocation6], %s395_s0, %s395_s0, %s396_s7  }
  0x23   :  { %387 = dma.done.wait [#allocation3], 32  }
  0x24   :  { %388 = vsyncadd [#allocation3], 4294967264 }
  0x25   :  { %389 = dma.done.wait [#allocation6], 2048  }
  0x26   :  { %390 = vsyncadd [#allocation6], 4294965248  ;;  %v397_v0 = vmov 2   ;;  %v398_v1 = vmov 0   ;;  %v399_v2 = vmov 0.0|0.0   ;;  %v101_v4 = vld [vmem:[#allocation5] sm:$0xff]  ;;  %v42_v35 = vlaneseq }
  0x27   :  { %314 = vset.pattern.permute.xlu1 %v397_v0  ;;  %312 = vset.pattern.permute.xlu0 %v398_v1  ;;  %v41_v3 = vld [vmem:[#allocation2] sm:$0x3]  ;;  %v102_v5 = vld [vmem:[#allocation5 + $0x8] sm:$0xff]  ;;  %v103_v7 = vld [vmem:[#allocation5 + $0x10] sm:$0xff]  ;;  %v400_v10 = vmov 3   ;;  %v401_v11 = vmov 1  }
  0x28   :  { %272 = vmatprep.subr.bf16.mxu0 %v399_v2  ;;  %59 = vperm.xlu1 %314, %v41_v3   ;;  %v273_v6 = vpack.c.bf16 %v102_v5, %v101_v4  ;;  %v104_v8 = vld [vmem:[#allocation5 + $0x18] sm:$0xff]  ;;  %v105_v12 = vld [vmem:[#allocation5 + $0x20] sm:$0xff]  ;;  %v106_v13 = vld [vmem:[#allocation5 + $0x28] sm:$0xff]  ;;  %v402_v17 = vmov 4   ;;  %v403_v18 = vmov 5   ;;  %v404_v22 = vmov 6  }
  0x29   :  { %45 = vperm.xlu0 %312, %v41_v3   ;;  %v276_v9 = vpack.c.bf16 %v104_v8, %v103_v7  ;;  %v279_v14 = vpack.c.bf16 %v106_v13, %v105_v12  ;;  %v107_v15 = vld [vmem:[#allocation5 + $0x30] sm:$0xff]  ;;  %v108_v16 = vld [vmem:[#allocation5 + $0x38] sm:$0xff]  ;;  %v109_v20 = vld [vmem:[#allocation5 + $0x40] sm:$0xff]  ;;  %v405_v23 = vmov 7   ;;  %vm406_vm0 = vmmov 0   ;;  %s408_s11 = smov [#allocation7]  }
  0x2a   :  { %274 = vmatpush3.bf16.msra.mxu0 %v273_v6  ;;  %v282_v19 = vpack.c.bf16 %v108_v16, %v107_v15  ;;  %v110_v21 = vld [vmem:[#allocation5 + $0x48] sm:$0xff]  ;;  %v111_v25 = vld [vmem:[#allocation5 + $0x50] sm:$0xff]  ;;  %v112_v26 = vld [vmem:[#allocation5 + $0x58] sm:$0xff]  ;;  %v407_v33 = vmov 0.0   ;;  %v43_v38 = vand.u32 127, %v42_v35  ;;  %s201_s12 = sshll.u32 %s408_s11, 4  ;;  %s202_s12 = int_to_ptr.vmem [resolvable:$true] %s201_s12 }
  0x2b   :  { %275 = vmatprep.subr.bf16.mxu0 %v399_v2  ;;  %v285_v24 = vpack.c.bf16 %v110_v21, %v109_v20  ;;  %v288_v27 = vpack.c.bf16 %v112_v26, %v111_v25  ;;  %v113_v28 = vld [vmem:[#allocation5 + $0x60] sm:$0xff]  ;;  %v114_v29 = vld [vmem:[#allocation5 + $0x68] sm:$0xff]  ;;  %v115_v31 = vld [vmem:[#allocation5 + $0x70] sm:$0xff]  ;;  %269 = vmatprep.mubr.msk.f32.mxu0 %vm406_vm0, %v407_v33  ;;  %s365_s13 = scalar_lea.vmem %s202_s12, 32  ;;  %p370_p3 = scmp.lt.s32.totalorder %s202_s12, %s202_s12 }
  0x2c   :  { %315 = vset.pattern.permute.xlu1 %v400_v10  ;;  %v291_v30 = vpack.c.bf16 %v114_v29, %v113_v28  ;;  %v116_v32 = vld [vmem:[#allocation5 + $0x78] sm:$0xff]  ;;  %p366_p2 = scmp.ne.s32.totalorder %s202_s12, %s365_s13  ;;  %p371_p4 = scmp.lt.s32.totalorder %s365_s13, %s365_s13 }
  0x2d   :  { %313 = vset.pattern.permute.xlu0 %v401_v11  ;;  %66 = vperm.xlu1 %315, %v41_v3   ;;  %v294_v34 = vpack.c.bf16 %v116_v32, %v115_v31  ;;  %v219_v61 = vld [vmem:[%s485_s2] ss:$0 sm:$0xff] }
  0x2e   :  { %52 = vperm.xlu0 %313, %v41_v3   ;;  %277 = vmatpush3.bf16.msra.mxu0 %v276_v9  ;;  %p372_p5 = por %p371_p4, %p370_p3 }
  0x2f   :  { %278 = vmatprep.subr.bf16.mxu0 %v399_v2 }
  0x30   :  { %p373_p6 = pnand %p372_p5, %p366_p2 }
  0x31   :  { %316 = vset.pattern.permute.xlu1 %v402_v17 }
  0x32   :  { %317 = vset.pattern.permute.xlu0 %v403_v18  ;;  %73 = vperm.xlu1 %316, %v41_v3  }
  0x33   :  { %80 = vperm.xlu0 %317, %v41_v3   ;;  %280 = vmatpush3.bf16.msra.mxu0 %v279_v14 }
  0x34   :  { %281 = vmatprep.subr.bf16.mxu0 %v399_v2 }
  0x36   :  { %318 = vset.pattern.permute.xlu1 %v404_v22 }
  0x37   :  { %320 = vset.pattern.permute.xlu0 %v405_v23  ;;  %87 = vperm.xlu1 %318, %v41_v3  }
  0x38   :  { %283 = vmatpush3.bf16.msra.mxu0 %v282_v19 }
  0x39   :  { %284 = vmatprep.subr.bf16.mxu0 %v399_v2 }
  0x3b   :  { %319 = vset.pattern.permute.xlu1 %v405_v23 }
  0x3c   :  { %286 = vmatpush3.bf16.msra.mxu0 %v285_v24  ;;  %94 = vperm.xlu1 %319, %v41_v3  }
  0x3d   :  { %287 = vmatprep.subr.bf16.mxu0 %v399_v2 }
  0x40   :  { %289 = vmatpush3.bf16.msra.mxu0 %v288_v27 }
  0x41   :  { %290 = vmatprep.subr.bf16.mxu0 %v399_v2 }
  0x44   :  { %292 = vmatpush3.bf16.msra.mxu0 %v291_v30 }
  0x45   :  { %293 = vmatprep.subr.bf16.mxu0 %v399_v2 }
  0x48   :  { %295 = vmatpush3.bf16.msra.mxu0 %v294_v34 }
  0xa7   :  { %v60_v36 = vpop.permute.xlu1 %59 }
  0xa8   :  { %v46_v37 = vpop.permute.xlu0 %45  ;;  %vm61_vm2 = vcmp.eq.s32.totalorder %v60_v36, %v43_v38 }
  0xa9   :  { %vm47_vm1 = vcmp.eq.s32.totalorder %v46_v37, %v43_v38  ;;  %v213_v44 = vsel %vm61_vm2, 1.0, %v407_v33 }
  0xaa   :  { %v211_v41 = vsel %vm47_vm1, 1.0, %v407_v33 }
  0xac   :  { %v67_v39 = vpop.permute.xlu1 %66 }
  0xad   :  { %v53_v40 = vpop.permute.xlu0 %52  ;;  %vm68_vm4 = vcmp.eq.s32.totalorder %v67_v39, %v43_v38 }
  0xae   :  { %vm54_vm3 = vcmp.eq.s32.totalorder %v53_v40, %v43_v38  ;;  %v214_v48 = vsel %vm68_vm4, 1.0, %v407_v33 }
  0xaf   :  { %v212_v42 = vsel %vm54_vm3, 1.0, %v407_v33 }
  0xb0   :  { %v57_v43 = vadd.f32 %v212_v42, %v211_v41 }
  0xb1   :  { %v74_v46 = vpop.permute.xlu1 %73 }
  0xb2   :  { %v64_v45 = vadd.f32 %v213_v44, %v57_v43  ;;  %v81_v47 = vpop.permute.xlu0 %80  ;;  %vm75_vm5 = vcmp.eq.s32.totalorder %v74_v46, %v43_v38 }
  0xb3   :  { %vm82_vm6 = vcmp.eq.s32.totalorder %v81_v47, %v43_v38  ;;  %v215_v50 = vsel %vm75_vm5, 1.0, %v407_v33 }
  0xb4   :  { %v71_v49 = vadd.f32 %v214_v48, %v64_v45  ;;  %v216_v52 = vsel %vm82_vm6, 1.0, %v407_v33 }
  0xb6   :  { %v78_v51 = vadd.f32 %v215_v50, %v71_v49  ;;  %v88_v53 = vpop.permute.xlu1 %87 }
  0xb7   :  { %vm89_vm7 = vcmp.eq.s32.totalorder %v88_v53, %v43_v38 }
  0xb8   :  { %v85_v54 = vadd.f32 %v216_v52, %v78_v51  ;;  %v217_v55 = vsel %vm89_vm7, 1.0, %v407_v33 }
  0xba   :  { %v92_v57 = vadd.f32 %v217_v55, %v85_v54 }
  0xbb   :  { %v95_v56 = vpop.permute.xlu1 %94 }
  0xbc   :  { %vm96_vm8 = vcmp.eq.s32.totalorder %v95_v56, %v43_v38 }
  0xbd   :  { %v218_v58 = vsel %vm96_vm8, 1.0, %v407_v33 }
  0xbe   :  { %v99_v59 = vadd.f32 %v218_v58, %v92_v57 }
  0xc0   :  { %v100_v60 = vmul.f32 0.125, %v99_v59 }
  0xc2   :  { %270 = vmatmul.mubr.f32.vlgmr.msra.gmra.mrb[0].mxu0 %v100_v60 }
 0x195   :  { %v190_v62 = vpop.f32.mrb[0].mxu0 }
 0x196   :  { %v191_v63 = vadd.f32 %v219_v61, %v190_v62  ;;  %v271_v0 = vpop.f32.mrb[1].mxu0 }
 0x198   :  { %194 = vst [vmem:[#allocation7] sm:$0x3] %v191_v63 }
 0x199   :  { %376 = shalt.err (!%p373_p6)
}
 0x19a   :  { %s377_s16 = scalar_lea.hbm %s486_s3, 32 }
 0x19b   :  { %p378_p7 = scmp.ne.s32.totalorder %s486_s3, %s377_s16  ;;  %p381_p8 = scmp.lt.u32.totalorder %s377_s16, %s486_s3 }
 0x19d   :  { %p383_p9 = pnand %p381_p8, %p378_p7 }
 0x19f   :  { %386 = shalt.err (!%p383_p9)
}
 0x1a0   :  { %204 = dma.vmem_to_hbm [thread:$0]  %s202_s12, 32, %s486_s3, [#allocation4]  }
 0x1a1   :  { %391 = dma.done.wait [#allocation4], 32  }
 0x1a2   :  { %392 = vsyncadd [#allocation4], 4294967264 }
 0x1a3   :  { %208 = vsyncpa [#allocation3], 1 }
 0x1a4   :  { %209 = vsyncpa [#allocation6], 1 }
 0x1a5   :  { %210 = vsyncpa [#allocation4], 1 }

</bundles_post_ra>
